<compile_context>
chip_gen: v5e
topology: v5e:2x2
jax: 0.10.0
libtpu: 0.0.40
codegen_flags: <defaults>
</compile_context>

<pallas_src>
import jax
import jax.numpy as jnp
from jax import lax
from jax.experimental import pallas as pl
from jax.experimental.pallas import tpu as pltpu


# ----------------------------------------------------------------------------
# Kernel
# ----------------------------------------------------------------------------
def _actor_kernel(x_ref,
                  w1_ref, b1_ref,
                  w2_ref, b2_ref,
                  w3_ref, b3_ref,
                  w4t_ref, b4t_ref,
                  o_ref):
    # x: bf16 [block_b, state_dim]; weights bf16; biases f32.
    x = x_ref[...]

    # Layer 1: Linear + ReLU (f32 accumulate + f32 elementwise).
    h = jnp.dot(x, w1_ref[...], preferred_element_type=jnp.float32) + b1_ref[...]
    h = jnp.maximum(h, 0.0)

    # Layer 2: Linear + ReLU.
    h = jnp.dot(h.astype(jnp.bfloat16), w2_ref[...],
                preferred_element_type=jnp.float32) + b2_ref[...]
    h = jnp.maximum(h, 0.0)

    # Layer 3: Linear + Hardswish  (x * relu6(x + 3) / 6).
    z = jnp.dot(h.astype(jnp.bfloat16), w3_ref[...],
                preferred_element_type=jnp.float32) + b3_ref[...]
    h = z * jnp.clip(z + 3.0, 0.0, 6.0) * (1.0 / 6.0)

    # Layer 4 + tanh, produced directly in transposed (lane-dense) layout:
    #   w4t: [action_dim, mid]   h: [block_b, mid]
    #   contract both last dims  -> [action_dim, block_b]
    v_t = lax.dot_general(
        w4t_ref[...], h.astype(jnp.bfloat16),
        dimension_numbers=(((1,), (1,)), ((), ())),
        preferred_element_type=jnp.float32) + b4t_ref[...]
    o_ref[...] = jnp.tanh(v_t).astype(o_ref.dtype)


# ----------------------------------------------------------------------------
# Wrapper
# ----------------------------------------------------------------------------
def _round_up(x, m):
    return (x + m - 1) // m * m


def _choose_tiling(B):
    """Pick (block_b, padded_B).

    Small batches: a single tile (padded to a multiple of 8) -- per-step
    pipeline overhead (~0.35 us) would otherwise dominate tiny tiles.
    Large batches: 128..512-row tiles, multiples of 128 so the transposed
    lane-dense output block keeps the unmasked store path, and capped at
    ~half the batch so the grid has >=2 steps (v7x megacore sharding).
    """
    if B <= 256:
        bb = _round_up(max(B, 8), 8)
        return bb, bb
    bb = max(128, min(512, _round_up(B // 2, 128)))
    return bb, _round_up(B, bb)


@jax.jit
def actor_ppo_forward(state, params):
    """state: [B, state_dim] f32 -> actions in [-1, 1], shape [B, action_dim]."""
    w1, b1, w2, b2, w3, b3, w4t, b4t = params
    B, state_dim = state.shape
    mid_dim = w1.shape[1]
    action_dim = w4t.shape[0]

    block_b, Bp = _choose_tiling(B)

    bf = lambda a: a.astype(jnp.bfloat16)
    x = bf(state)
    if Bp != B:
        x = jnp.pad(x, ((0, Bp - B), (0, 0)))

    full = lambda shape: pl.BlockSpec(shape, lambda i: (0, 0))

    out_t = pl.pallas_call(
        _actor_kernel,
        out_shape=jax.ShapeDtypeStruct((action_dim, Bp), jnp.float32),
        grid_spec=pltpu.PrefetchScalarGridSpec(
            num_scalar_prefetch=0,
            grid=(Bp // block_b,),
            in_specs=[
                pl.BlockSpec((block_b, state_dim), lambda i: (i, 0)),   # state tile
                full((state_dim, mid_dim)), full((1, mid_dim)),          # layer 1
                full((mid_dim, mid_dim)),   full((1, mid_dim)),          # layer 2
                full((mid_dim, mid_dim)),   full((1, mid_dim)),          # layer 3
                full((action_dim, mid_dim)), full((action_dim, 1)),      # layer 4 (pre-T)
            ],
            out_specs=pl.BlockSpec((action_dim, block_b), lambda i: (0, i)),
        ),
        compiler_params=pltpu.CompilerParams(
            dimension_semantics=("parallel",)),
    )(x, bf(w1), b1, bf(w2), b2, bf(w3), b3, bf(w4t), b4t)

    # (action_dim, Bp) lane-dense slab -> (B, action_dim)
    return out_t.T[:B]


# ----------------------------------------------------------------------------
# Parameter init (mirrors the PyTorch module's shapes / layer_norm helper)
# ----------------------------------------------------------------------------
def init_params(key, state_dim, mid_dim, action_dim):
    """Hidden layers: uniform (stand-in for PyTorch kaiming-uniform).
    Final layer: orthogonal with gain 0.1, bias = 1e-6 (layer_norm helper).
    Hidden weights stored [in, out]; final weight kept in PyTorch layout
    [out, in] because the kernel consumes it pre-transposed.
    """
    k1, k2, k3, k4 = jax.random.split(key, 4)

    def uniform_linear(k, fan_in, fan_out):
        bound = 1.0 / jnp.sqrt(jnp.float32(fan_in))
        kw, kb = jax.random.split(k)
        w = jax.random.uniform(kw, (fan_in, fan_out), jnp.float32, -bound, bound)
        b = jax.random.uniform(kb, (1, fan_out), jnp.float32, -bound, bound)
        return w, b

    w1, b1 = uniform_linear(k1, state_dim, mid_dim)
    w2, b2 = uniform_linear(k2, mid_dim, mid_dim)
    w3, b3 = uniform_linear(k3, mid_dim, mid_dim)

    orth = jax.nn.initializers.orthogonal(scale=0.1)
    w4t = orth(k4, (action_dim, mid_dim), jnp.float32)       # [out, in]
    b4t = jnp.full((action_dim, 1), 1e-6, jnp.float32)        # column bias

    # TODO(synk): a_logstd (= -0.5) only feeds get_action / get_logprob_entropy
    # (sampling & log-prob utilities), not forward(); it is not kernelized.
    return (w1, b1, w2, b2, w3, b3, w4t, b4t)


def reference_forward(state, params):
    """Pure-JAX reference mirroring the kernel's bf16-operand / f32-accum math."""
    w1, b1, w2, b2, w3, b3, w4t, b4t = params
    bf = lambda a: a.astype(jnp.bfloat16)
    h = jnp.maximum(jnp.dot(bf(state), bf(w1),
                            preferred_element_type=jnp.float32) + b1, 0.0)
    h = jnp.maximum(jnp.dot(bf(h), bf(w2),
                            preferred_element_type=jnp.float32) + b2, 0.0)
    z = jnp.dot(bf(h), bf(w3), preferred_element_type=jnp.float32) + b3
    h = z * jnp.clip(z + 3.0, 0.0, 6.0) / 6.0
    v = jnp.dot(bf(h), bf(w4t).T, preferred_element_type=jnp.float32) + b4t.T
    return jnp.tanh(v)


if __name__ == "__main__":
    state_dim, mid_dim, action_dim = 16, 32, 4

    key = jax.random.PRNGKey(0)
    k_param, k_s1, k_s2 = jax.random.split(key, 3)
    params = init_params(k_param, state_dim, mid_dim, action_dim)

    # Exercise both tiling paths: single-tile (B=64) and padded multi-tile (B=300).
    for batch, ks in ((64, k_s1), (300, k_s2)):
        state = jax.random.normal(ks, (batch, state_dim), jnp.float32)

        out = jax.block_until_ready(actor_ppo_forward(state, params))
        ref = reference_forward(state, params)

        assert out.shape == (batch, action_dim), out.shape
        assert bool(jnp.all(jnp.abs(out) <= 1.0)), "tanh range violated"
        assert jnp.allclose(out, ref, atol=5e-3, rtol=5e-3), (
            float(jnp.max(jnp.abs(out - ref))))

    print("KERNEL_OK")
</pallas_src>

<mosaic_0001>
module attributes {stable_mosaic.version = 11 : i64} {
  func.func @_actor_kernel(%arg0: i32, %arg1: memref<64x16xbf16, #tpu.memory_space<vmem>>, %arg2: memref<16x32xbf16, #tpu.memory_space<vmem>>, %arg3: memref<1x32xf32, #tpu.memory_space<vmem>>, %arg4: memref<32x32xbf16, #tpu.memory_space<vmem>>, %arg5: memref<1x32xf32, #tpu.memory_space<vmem>>, %arg6: memref<32x32xbf16, #tpu.memory_space<vmem>>, %arg7: memref<1x32xf32, #tpu.memory_space<vmem>>, %arg8: memref<4x32xbf16, #tpu.memory_space<vmem>>, %arg9: memref<4x1xf32, #tpu.memory_space<vmem>>, %arg10: memref<4x64xf32, #tpu.memory_space<vmem>>) attributes {dimension_semantics = [#tpu.dimension_semantics<parallel>], iteration_bounds = array<i64: 1>, scalar_prefetch = 0 : i64, scratch_operands = 0 : i64, tpu.core_type = #tpu.core_type<tc>, window_params = [{transform_indices = @transform_0, window_bounds = array<i64: 64, 16>}, {pipeline_mode = #tpu.pipeline_mode<synchronous>, transform_indices = @transform_1, window_bounds = array<i64: 16, 32>}, {pipeline_mode = #tpu.pipeline_mode<synchronous>, transform_indices = @transform_2, window_bounds = array<i64: 1, 32>}, {pipeline_mode = #tpu.pipeline_mode<synchronous>, transform_indices = @transform_3, window_bounds = array<i64: 32, 32>}, {pipeline_mode = #tpu.pipeline_mode<synchronous>, transform_indices = @transform_4, window_bounds = array<i64: 1, 32>}, {pipeline_mode = #tpu.pipeline_mode<synchronous>, transform_indices = @transform_5, window_bounds = array<i64: 32, 32>}, {pipeline_mode = #tpu.pipeline_mode<synchronous>, transform_indices = @transform_6, window_bounds = array<i64: 1, 32>}, {pipeline_mode = #tpu.pipeline_mode<synchronous>, transform_indices = @transform_7, window_bounds = array<i64: 4, 32>}, {pipeline_mode = #tpu.pipeline_mode<synchronous>, transform_indices = @transform_8, window_bounds = array<i64: 4, 1>}, {transform_indices = @transform_9, window_bounds = array<i64: 4, 64>}]} {
    %c0 = arith.constant 0 : index
    %c0_0 = arith.constant 0 : index
    %0 = vector.load %arg1[%c0, %c0_0] : memref<64x16xbf16, #tpu.memory_space<vmem>>, vector<64x16xbf16>
    %c0_1 = arith.constant 0 : index
    %c0_2 = arith.constant 0 : index
    %1 = vector.load %arg2[%c0_1, %c0_2] : memref<16x32xbf16, #tpu.memory_space<vmem>>, vector<16x32xbf16>
    %cst = arith.constant dense<0.000000e+00> : vector<64x32xf32>
    %2 = tpu.matmul %0, %1, %cst {dimension_numbers = #tpu.dot_dimension_numbers<[1], [0], [0], [1], [0, 0, 1, 1], [], []>} : vector<64x16xbf16>, vector<16x32xbf16>, vector<64x32xf32> -> vector<64x32xf32>
    %c0_3 = arith.constant 0 : index
    %c0_4 = arith.constant 0 : index
    %3 = vector.load %arg3[%c0_3, %c0_4] : memref<1x32xf32, #tpu.memory_space<vmem>>, vector<1x32xf32>
    %4 = vector.broadcast %3 : vector<1x32xf32> to vector<64x32xf32>
    %5 = arith.addf %2, %4 : vector<64x32xf32>
    %cst_5 = arith.constant 0.000000e+00 : f32
    %6 = vector.broadcast %cst_5 : f32 to vector<64x32xf32>
    %7 = arith.maximumf %5, %6 : vector<64x32xf32>
    %8 = arith.truncf %7 : vector<64x32xf32> to vector<64x32xbf16>
    %c0_6 = arith.constant 0 : index
    %c0_7 = arith.constant 0 : index
    %9 = vector.load %arg4[%c0_6, %c0_7] : memref<32x32xbf16, #tpu.memory_space<vmem>>, vector<32x32xbf16>
    %cst_8 = arith.constant dense<0.000000e+00> : vector<64x32xf32>
    %10 = tpu.matmul %8, %9, %cst_8 {dimension_numbers = #tpu.dot_dimension_numbers<[1], [0], [0], [1], [0, 0, 1, 1], [], []>} : vector<64x32xbf16>, vector<32x32xbf16>, vector<64x32xf32> -> vector<64x32xf32>
    %c0_9 = arith.constant 0 : index
    %c0_10 = arith.constant 0 : index
    %11 = vector.load %arg5[%c0_9, %c0_10] : memref<1x32xf32, #tpu.memory_space<vmem>>, vector<1x32xf32>
    %12 = vector.broadcast %11 : vector<1x32xf32> to vector<64x32xf32>
    %13 = arith.addf %10, %12 : vector<64x32xf32>
    %cst_11 = arith.constant 0.000000e+00 : f32
    %14 = vector.broadcast %cst_11 : f32 to vector<64x32xf32>
    %15 = arith.maximumf %13, %14 : vector<64x32xf32>
    %16 = arith.truncf %15 : vector<64x32xf32> to vector<64x32xbf16>
    %c0_12 = arith.constant 0 : index
    %c0_13 = arith.constant 0 : index
    %17 = vector.load %arg6[%c0_12, %c0_13] : memref<32x32xbf16, #tpu.memory_space<vmem>>, vector<32x32xbf16>
    %cst_14 = arith.constant dense<0.000000e+00> : vector<64x32xf32>
    %18 = tpu.matmul %16, %17, %cst_14 {dimension_numbers = #tpu.dot_dimension_numbers<[1], [0], [0], [1], [0, 0, 1, 1], [], []>} : vector<64x32xbf16>, vector<32x32xbf16>, vector<64x32xf32> -> vector<64x32xf32>
    %c0_15 = arith.constant 0 : index
    %c0_16 = arith.constant 0 : index
    %19 = vector.load %arg7[%c0_15, %c0_16] : memref<1x32xf32, #tpu.memory_space<vmem>>, vector<1x32xf32>
    %20 = vector.broadcast %19 : vector<1x32xf32> to vector<64x32xf32>
    %21 = arith.addf %18, %20 : vector<64x32xf32>
    %cst_17 = arith.constant 3.000000e+00 : f32
    %22 = vector.broadcast %cst_17 : f32 to vector<64x32xf32>
    %23 = arith.addf %21, %22 : vector<64x32xf32>
    %cst_18 = arith.constant 0.000000e+00 : f32
    %cst_19 = arith.constant 6.000000e+00 : f32
    %24 = vector.broadcast %cst_18 : f32 to vector<64x32xf32>
    %25 = arith.maximumf %24, %23 : vector<64x32xf32>
    %26 = vector.broadcast %cst_19 : f32 to vector<64x32xf32>
    %27 = arith.minimumf %26, %25 : vector<64x32xf32>
    %28 = arith.mulf %21, %27 : vector<64x32xf32>
    %cst_20 = arith.constant 0.166666672 : f32
    %29 = vector.broadcast %cst_20 : f32 to vector<64x32xf32>
    %30 = arith.mulf %28, %29 : vector<64x32xf32>
    %c0_21 = arith.constant 0 : index
    %c0_22 = arith.constant 0 : index
    %31 = vector.load %arg8[%c0_21, %c0_22] : memref<4x32xbf16, #tpu.memory_space<vmem>>, vector<4x32xbf16>
    %32 = arith.truncf %30 : vector<64x32xf32> to vector<64x32xbf16>
    %cst_23 = arith.constant dense<0.000000e+00> : vector<4x64xf32>
    %33 = tpu.matmul %31, %32, %cst_23 {dimension_numbers = #tpu.dot_dimension_numbers<[1], [1], [0], [0], [0, 0, 1, 0], [], []>} : vector<4x32xbf16>, vector<64x32xbf16>, vector<4x64xf32> -> vector<4x64xf32>
    %c0_24 = arith.constant 0 : index
    %c0_25 = arith.constant 0 : index
    %34 = vector.load %arg9[%c0_24, %c0_25] : memref<4x1xf32, #tpu.memory_space<vmem>>, vector<4x1xf32>
    %35 = vector.broadcast %34 : vector<4x1xf32> to vector<4x64xf32>
    %36 = arith.addf %33, %35 : vector<4x64xf32>
    %37 = math.tanh %36 : vector<4x64xf32>
    %c0_26 = arith.constant 0 : index
    %c0_27 = arith.constant 0 : index
    %38 = vector.load %arg10[%c0_26, %c0_27] : memref<4x64xf32, #tpu.memory_space<vmem>>, vector<4x64xf32>
    tpu.vector_store %arg10[%c0_26, %c0_27], %37 {strides = array<i32>} : memref<4x64xf32, #tpu.memory_space<vmem>>, vector<4x64xf32>,
    return
  }
  func.func @transform_0(%arg0: i32) -> (i32, i32) {
    %c0_i32 = arith.constant 0 : i32
    %c0_i32_0 = arith.constant 0 : i32
    return %arg0, %c0_i32 : i32, i32
  }
  func.func @transform_1(%arg0: i32) -> (i32, i32) {
    %c0_i32 = arith.constant 0 : i32
    %c0_i32_0 = arith.constant 0 : i32
    %c0_i32_1 = arith.constant 0 : i32
    return %c0_i32, %c0_i32_0 : i32, i32
  }
  func.func @transform_2(%arg0: i32) -> (i32, i32) {
    %c0_i32 = arith.constant 0 : i32
    %c0_i32_0 = arith.constant 0 : i32
    %c0_i32_1 = arith.constant 0 : i32
    return %c0_i32, %c0_i32_0 : i32, i32
  }
  func.func @transform_3(%arg0: i32) -> (i32, i32) {
    %c0_i32 = arith.constant 0 : i32
    %c0_i32_0 = arith.constant 0 : i32
    %c0_i32_1 = arith.constant 0 : i32
    return %c0_i32, %c0_i32_0 : i32, i32
  }
  func.func @transform_4(%arg0: i32) -> (i32, i32) {
    %c0_i32 = arith.constant 0 : i32
    %c0_i32_0 = arith.constant 0 : i32
    %c0_i32_1 = arith.constant 0 : i32
    return %c0_i32, %c0_i32_0 : i32, i32
  }
  func.func @transform_5(%arg0: i32) -> (i32, i32) {
    %c0_i32 = arith.constant 0 : i32
    %c0_i32_0 = arith.constant 0 : i32
    %c0_i32_1 = arith.constant 0 : i32
    return %c0_i32, %c0_i32_0 : i32, i32
  }
  func.func @transform_6(%arg0: i32) -> (i32, i32) {
    %c0_i32 = arith.constant 0 : i32
    %c0_i32_0 = arith.constant 0 : i32
    %c0_i32_1 = arith.constant 0 : i32
    return %c0_i32, %c0_i32_0 : i32, i32
  }
  func.func @transform_7(%arg0: i32) -> (i32, i32) {
    %c0_i32 = arith.constant 0 : i32
    %c0_i32_0 = arith.constant 0 : i32
    %c0_i32_1 = arith.constant 0 : i32
    return %c0_i32, %c0_i32_0 : i32, i32
  }
  func.func @transform_8(%arg0: i32) -> (i32, i32) {
    %c0_i32 = arith.constant 0 : i32
    %c0_i32_0 = arith.constant 0 : i32
    %c0_i32_1 = arith.constant 0 : i32
    return %c0_i32, %c0_i32_0 : i32, i32
  }
  func.func @transform_9(%arg0: i32) -> (i32, i32) {
    %c0_i32 = arith.constant 0 : i32
    %c0_i32_0 = arith.constant 0 : i32
    return %c0_i32, %arg0 : i32, i32
  }
}

</mosaic_0001>

<bundles_post_ra>
// kernel: actor_ppo_forward.1
= control target key start
LH: loop header
LB: loop body
LE: loop exit
PB: predicated region body
PF: predicated region fallthrough
CT: control target
= control target key end

     0   :  { %vm74_vm0 = vcmask 130048   ;;  %s563_s0 = inlined_call_operand.vmem [shape: bf16[64,16], index: 0, kind: input, shape index: {}]   ;;  %s564_s1 = inlined_call_operand.vmem [shape: bf16[16,32], index: 1, kind: input, shape index: {}]   ;;  %s565_s2 = inlined_call_operand.vmem [shape: f32[1,32], index: 2, kind: input, shape index: {}]   ;;  %s566_s3 = inlined_call_operand.vmem [shape: bf16[32,32], index: 3, kind: input, shape index: {}]   ;;  %s567_s4 = inlined_call_operand.vmem [shape: f32[1,32], index: 4, kind: input, shape index: {}]   ;;  %s568_s5 = inlined_call_operand.vmem [shape: bf16[32,32], index: 5, kind: input, shape index: {}]   ;;  %s569_s6 = inlined_call_operand.vmem [shape: f32[1,32], index: 6, kind: input, shape index: {}]   ;;  %s570_s7 = inlined_call_operand.vmem [shape: bf16[4,32], index: 7, kind: input, shape index: {}]   ;;  %s571_s8 = inlined_call_operand.vmem [shape: f32[4,1], index: 8, kind: input, shape index: {}]   ;;  %s572_s9 = inlined_call_operand.hbm [shape: f32[4,64], index: 9, kind: output, shape index: {}]  }
   0x1   :  { %v414_v0 = vld [vmem:[%s564_s1] sm:$0xff] }
   0x2   :  { %v410_v1 = vld [vmem:[%s563_s0] sm:$0xff]  ;;  %94 = vmatpush.bf16.msra.mxu0 %v414_v0 }
   0x3   :  { %14 = vsyncpa [#allocation3], 0  ;;  %v411_v2 = vld [vmem:[%s563_s0 + $0x8] sm:$0xff]  ;;  %v412_v3 = vld [vmem:[%s563_s0 + $0x10] sm:$0xff]  ;;  %vm148_vm1 = vcmask 261120   ;;  %s454_s29 = smov [#allocation2]  }
   0x4   :  { %v413_v4 = vld [vmem:[%s563_s0 + $0x18] sm:$0xff]  ;;  %v416_v5 = vld [vmem:[%s566_s3 + $0x8] sm:$0xff]  ;;  %v415_v6 = vld [vmem:[%s566_s3] sm:$0xff]  ;;  %s350_s30 = sshll.u32 %s454_s29, 4  ;;  %s352_s12 = sshll.u32 %s572_s9, 4  ;;  %vm343_vm2 = vcmask 519168   ;;  %s351_s30 = int_to_ptr.vmem [resolvable:$true] %s350_s30  ;;  %s353_s12 = int_to_ptr.hbm [resolvable:$true] %s352_s12 }
   0x5   :  { %381 = vmatmul.msk.bf16.vlgmr.msra.gmra.mxu0 %vm74_vm0, %v410_v1  ;;  %167 = vmatpush.bf16.msra.mxu1 %v416_v5  ;;  %v422_v8 = vld [vmem:[%s565_s2] ss:$0 sm:$0xff]  ;;  %v418_v36 = vld [vmem:[%s568_s5 + $0x8] sm:$0xff] }
   0x6   :  { %240 = vmatpush.bf16.msra.mxu2 %v418_v36  ;;  %v417_v37 = vld [vmem:[%s568_s5] sm:$0xff] }
   0x7   :  { %v423_v39 = vld [vmem:[%s567_s4] ss:$0 sm:$0xff] }
   0x9   :  { %168 = vmatpush.bf16.msra.mxu1 %v415_v6 }
   0xa   :  { %241 = vmatpush.bf16.msra.mxu2 %v417_v37 }
  0x15   :  { %382 = vmatmul.msk.bf16.gmra.mxu0 %vm74_vm0, %v411_v2 }
  0x25   :  { %383 = vmatmul.msk.bf16.gmra.mxu0 %vm74_vm0, %v412_v3  ;;  %v424_v3 = vld [vmem:[%s569_s6] ss:$0 sm:$0xff] }
  0x35   :  { %384 = vmatmul.msk.bf16.gmra.mxu0 %vm74_vm0, %v413_v4 }
  0x82   :  { %v96_v7 = vpop.f32.mrf.mxu0 }
  0x83   :  { %v97_v9 = vadd.f32 %v422_v8, %v96_v7 }
  0x85   :  { %v116_v12 = vmax.f32 %v97_v9, 0.0 }
  0x8a   :  { %v98_v10 = vpop.f32.mrf.mxu0 }
  0x8b   :  { %v99_v11 = vadd.f32 %v422_v8, %v98_v10 }
  0x8d   :  { %v117_v13 = vmax.f32 %v99_v11, 0.0 }
  0x8f   :  { %v124_v14 = vpack.c.bf16 %v117_v13, %v116_v12 }
  0x91   :  { %393 = vmatmul.msk.bf16.vlgmr.msra.gmra.mxu1 %vm148_vm1, %v124_v14 }
  0x92   :  { %v101_v15 = vpop.f32.mrf.mxu0 }
  0x93   :  { %v102_v16 = vadd.f32 %v422_v8, %v101_v15 }
  0x95   :  { %v118_v19 = vmax.f32 %v102_v16, 0.0 }
  0x9a   :  { %v103_v17 = vpop.f32.mrf.mxu0 }
  0x9b   :  { %v104_v18 = vadd.f32 %v422_v8, %v103_v17 }
  0x9d   :  { %v119_v20 = vmax.f32 %v104_v18, 0.0 }
  0x9f   :  { %v125_v21 = vpack.c.bf16 %v119_v20, %v118_v19 }
  0xa1   :  { %394 = vmatmul.msk.bf16.gmra.mxu1 %vm148_vm1, %v125_v21 }
  0xa2   :  { %v106_v22 = vpop.f32.mrf.mxu0 }
  0xa3   :  { %v107_v23 = vadd.f32 %v422_v8, %v106_v22 }
  0xa5   :  { %v120_v26 = vmax.f32 %v107_v23, 0.0 }
  0xaa   :  { %v108_v24 = vpop.f32.mrf.mxu0 }
  0xab   :  { %v109_v25 = vadd.f32 %v422_v8, %v108_v24 }
  0xad   :  { %v121_v27 = vmax.f32 %v109_v25, 0.0 }
  0xaf   :  { %v126_v28 = vpack.c.bf16 %v121_v27, %v120_v26 }
  0xb1   :  { %395 = vmatmul.msk.bf16.gmra.mxu1 %vm148_vm1, %v126_v28 }
  0xb2   :  { %v111_v29 = vpop.f32.mrf.mxu0 }
  0xb3   :  { %v112_v30 = vadd.f32 %v422_v8, %v111_v29 }
  0xb5   :  { %v122_v33 = vmax.f32 %v112_v30, 0.0 }
  0xba   :  { %v113_v31 = vpop.f32.mrf.mxu0 }
  0xbb   :  { %v114_v32 = vadd.f32 %v422_v8, %v113_v31 }
  0xbd   :  { %v123_v34 = vmax.f32 %v114_v32, 0.0 }
  0xbf   :  { %v127_v35 = vpack.c.bf16 %v123_v34, %v122_v33 }
  0xc1   :  { %396 = vmatmul.msk.bf16.gmra.mxu1 %vm148_vm1, %v127_v35 }
 0x10e   :  { %v170_v38 = vpop.f32.mrf.mxu1 }
 0x10f   :  { %v171_v40 = vadd.f32 %v423_v39, %v170_v38 }
 0x111   :  { %v190_v43 = vmax.f32 %v171_v40, 0.0 }
 0x116   :  { %v172_v41 = vpop.f32.mrf.mxu1 }
 0x117   :  { %v173_v42 = vadd.f32 %v423_v39, %v172_v41 }
 0x119   :  { %v191_v44 = vmax.f32 %v173_v42, 0.0 }
 0x11b   :  { %v198_v45 = vpack.c.bf16 %v191_v44, %v190_v43 }
 0x11d   :  { %405 = vmatmul.msk.bf16.vlgmr.msra.gmra.mxu2 %vm148_vm1, %v198_v45 }
 0x11e   :  { %v175_v46 = vpop.f32.mrf.mxu1 }
 0x11f   :  { %v176_v47 = vadd.f32 %v423_v39, %v175_v46 }
 0x121   :  { %v192_v50 = vmax.f32 %v176_v47, 0.0 }
 0x126   :  { %v177_v48 = vpop.f32.mrf.mxu1 }
 0x127   :  { %v178_v49 = vadd.f32 %v423_v39, %v177_v48 }
 0x129   :  { %v193_v51 = vmax.f32 %v178_v49, 0.0 }
 0x12b   :  { %v199_v52 = vpack.c.bf16 %v193_v51, %v192_v50 }
 0x12d   :  { %406 = vmatmul.msk.bf16.gmra.mxu2 %vm148_vm1, %v199_v52 }
 0x12e   :  { %v180_v53 = vpop.f32.mrf.mxu1 }
 0x12f   :  { %v181_v54 = vadd.f32 %v423_v39, %v180_v53 }
 0x131   :  { %v194_v57 = vmax.f32 %v181_v54, 0.0 }
 0x136   :  { %v182_v55 = vpop.f32.mrf.mxu1 }
 0x137   :  { %v183_v56 = vadd.f32 %v423_v39, %v182_v55 }
 0x139   :  { %v195_v58 = vmax.f32 %v183_v56, 0.0 }
 0x13b   :  { %v200_v59 = vpack.c.bf16 %v195_v58, %v194_v57  ;;  %v308_v57 = vld [vmem:[%s571_s8] sm:$0xf]  ;;  %v453_v58 = vmov 0  }
 0x13c   :  { %421 = vset.pattern.permute.xlu0 %v453_v58 }
 0x13d   :  { %407 = vmatmul.msk.bf16.gmra.mxu2 %vm148_vm1, %v200_v59  ;;  %311 = vperm.xlu0 %421, %v308_v57  }
 0x13e   :  { %v185_v60 = vpop.f32.mrf.mxu1 }
 0x13f   :  { %v186_v61 = vadd.f32 %v423_v39, %v185_v60 }
 0x141   :  { %v196_v0 = vmax.f32 %v186_v61, 0.0 }
 0x146   :  { %v187_v62 = vpop.f32.mrf.mxu1 }
 0x147   :  { %v188_v63 = vadd.f32 %v423_v39, %v187_v62 }
 0x149   :  { %v197_v1 = vmax.f32 %v188_v63, 0.0 }
 0x14b   :  { %v201_v2 = vpack.c.bf16 %v197_v1, %v196_v0 }
 0x14d   :  { %408 = vmatmul.msk.bf16.gmra.mxu2 %vm148_vm1, %v201_v2 }
 0x1a0   :  { %v243_v4 = vpop.f32.mrf.mxu2 }
 0x1a1   :  { %v244_v5 = vadd.f32 %v424_v3, %v243_v4 }
 0x1a3   :  { %v263_v6 = vadd.f32 3.0, %v244_v5 }
 0x1a5   :  { %v271_v7 = vmax.f32 %v263_v6, 0.0  ;;  %v303_v6 = vld [vmem:[%s570_s7] sm:$0x3] }
 0x1a7   :  { %v279_v10 = vmin.f32 %v271_v7, 6.0 }
 0x1a8   :  { %v245_v8 = vpop.f32.mrf.mxu2 }
 0x1a9   :  { %v246_v9 = vadd.f32 %v424_v3, %v245_v8  ;;  %v287_v13 = vmul.f32 %v279_v10, %v244_v5 }
 0x1ab   :  { %v264_v11 = vadd.f32 3.0, %v246_v9  ;;  %v295_v17 = vmul.f32 0.16666667, %v287_v13 }
 0x1ad   :  { %v272_v12 = vmax.f32 %v264_v11, 0.0 }
 0x1af   :  { %v280_v14 = vmin.f32 %v272_v12, 6.0  ;;  %v312_v7 = vpop.permute.xlu0 %311 }
 0x1b0   :  { %v248_v15 = vpop.f32.mrf.mxu2 }
 0x1b1   :  { %v288_v16 = vmul.f32 %v280_v14, %v246_v9  ;;  %v249_v37 = vadd.f32 %v424_v3, %v248_v15 }
 0x1b3   :  { %v296_v18 = vmul.f32 0.16666667, %v288_v16  ;;  %v265_v44 = vadd.f32 3.0, %v249_v37 }
 0x1b5   :  { %v304_v19 = vpack.c.bf16 %v296_v18, %v295_v17  ;;  %v273_v51 = vmax.f32 %v265_v44, 0.0 }
 0x1b7   :  { %v281_v59 = vmin.f32 %v273_v51, 6.0  ;;  %v318_v5 = vsel %vm148_vm1, %v304_v19, 0 }
 0x1b8   :  { %v250_v20 = vpop.f32.mrf.mxu2 }
 0x1b9   :  { %v251_v33 = vadd.f32 %v424_v3, %v250_v20  ;;  %v289_v63 = vmul.f32 %v281_v59, %v249_v37 }
 0x1bb   :  { %v266_v40 = vadd.f32 3.0, %v251_v33  ;;  %v297_v2 = vmul.f32 0.16666667, %v289_v63 }
 0x1bd   :  { %v274_v47 = vmax.f32 %v266_v40, 0.0 }
 0x1bf   :  { %v282_v54 = vmin.f32 %v274_v47, 6.0 }
 0x1c0   :  { %v253_v21 = vpop.f32.mrf.mxu2 }
 0x1c1   :  { %v254_v27 = vadd.f32 %v424_v3, %v253_v21  ;;  %v290_v61 = vmul.f32 %v282_v54, %v251_v33 }
 0x1c3   :  { %v267_v31 = vadd.f32 3.0, %v254_v27  ;;  %v298_v0 = vmul.f32 0.16666667, %v290_v61 }
 0x1c5   :  { %v275_v38 = vmax.f32 %v267_v31, 0.0 }
 0x1c7   :  { %v283_v45 = vmin.f32 %v275_v38, 6.0 }
 0x1c8   :  { %v255_v22 = vpop.f32.mrf.mxu2 }
 0x1c9   :  { %v256_v25 = vadd.f32 %v424_v3, %v255_v22  ;;  %v291_v52 = vmul.f32 %v283_v45, %v254_v27 }
 0x1cb   :  { %v268_v28 = vadd.f32 3.0, %v256_v25  ;;  %v299_v60 = vmul.f32 0.16666667, %v291_v52 }
 0x1cd   :  { %v276_v34 = vmax.f32 %v268_v28, 0.0 }
 0x1cf   :  { %v284_v41 = vmin.f32 %v276_v34, 6.0 }
 0x1d0   :  { %v258_v23 = vpop.f32.mrf.mxu2 }
 0x1d1   :  { %v259_v24 = vadd.f32 %v424_v3, %v258_v23  ;;  %v292_v48 = vmul.f32 %v284_v41, %v256_v25 }
 0x1d3   :  { %v269_v26 = vadd.f32 3.0, %v259_v24  ;;  %v300_v55 = vmul.f32 0.16666667, %v292_v48 }
 0x1d5   :  { %v277_v29 = vmax.f32 %v269_v26, 0.0  ;;  %v306_v62 = vpack.c.bf16 %v300_v55, %v299_v60 }
 0x1d7   :  { %v285_v35 = vmin.f32 %v277_v29, 6.0  ;;  %v324_v1 = vsel %vm148_vm1, %v306_v62, 0 }
 0x1d8   :  { %v260_v30 = vpop.f32.mrf.mxu2 }
 0x1d9   :  { %v261_v32 = vadd.f32 %v424_v3, %v260_v30  ;;  %v293_v42 = vmul.f32 %v285_v35, %v259_v24  ;;  %v305_v3 = vpack.c.bf16 %v298_v0, %v297_v2 }
 0x1db   :  { %v270_v36 = vadd.f32 3.0, %v261_v32  ;;  %v301_v49 = vmul.f32 0.16666667, %v293_v42  ;;  %v321_v4 = vsel %vm148_vm1, %v305_v3, 0 }
 0x1dd   :  { %v278_v39 = vmax.f32 %v270_v36, 0.0 }
 0x1df   :  { %v286_v43 = vmin.f32 %v278_v39, 6.0 }
 0x1e1   :  { %v294_v46 = vmul.f32 %v286_v43, %v261_v32 }
 0x1e3   :  { %v302_v50 = vmul.f32 0.16666667, %v294_v46 }
 0x1e5   :  { %v307_v53 = vpack.c.bf16 %v302_v50, %v301_v49 }
 0x1e7   :  { %v327_v56 = vsel %vm148_vm1, %v307_v53, 0 }
 0x1e8   :  { %333 = vmatpush.bf16.xpose.msra.mxu3 %v327_v56 }
 0x1f0   :  { %334 = vmatpush.bf16.xpose.msra.mxu3 %v324_v1 }
 0x1f8   :  { %335 = vmatpush.bf16.xpose.msra.mxu3 %v321_v4 }
 0x200   :  { %336 = vmatpush.bf16.xpose.msra.mxu3 %v318_v5 }
 0x207   :  { %409 = vmatmul.msk.bf16.vlgmr.msra.gmra.mxu3 %vm148_vm1, %v303_v6 }
 0x28a   :  { %v338_v8 = vpop.f32.mrf.mxu3 }
 0x28b   :  { %v339_v9 = vadd.f32 %v338_v8, %v312_v7 }
 0x28d   :  { %425 = vtanh.f32 %v339_v9 }
 0x292   :  { %v340_v10 = vpop.f32.mrf.mxu3 }
 0x293   :  { %v426_v11 = vpop.eup %425 }
 0x294   :  { %344 = vst.msk [vmem:[#allocation2] sm:$0xf] %vm343_vm2, %v426_v11 }
 0x295   :  { %355 = dma.vmem_to_hbm [thread:$0]  %s351_s30, 64, %s353_s12, [#allocation3]  }
 0x296   :  { %451 = dma.done.wait [#allocation3], 64  }
 0x297   :  { %452 = vsyncadd [#allocation3], 4294967232 }
 0x298   :  { %360 = vsyncpa [#allocation3], 1 }

</bundles_post_ra>
